<compile_context>
chip_gen: v6e
topology: v6e:2x2x1
jax: 0.10.0
libtpu: 0.0.40
codegen_flags: <defaults>
</compile_context>

<pallas_src>
import functools

import jax
import jax.numpy as jnp
from jax.experimental import pallas as pl
from jax.experimental.pallas import tpu as pltpu

F32 = jnp.float32
BF16 = jnp.bfloat16


# ----------------------------------------------------------------------------- #
# Prenet kernel:  two (Linear -> ReLU -> dropout(p=0.5, training=True)) layers.
# ----------------------------------------------------------------------------- #
def prenet_kernel(x_ref, m1_ref, m2_ref, w1_ref, b1_ref, w2_ref, b2_ref, o_ref):
    x = x_ref[...]
    h = jnp.maximum(jnp.dot(x, w1_ref[...], preferred_element_type=F32) + b1_ref[...], 0.0)
    h = h * (m1_ref[...].astype(F32) * 2.0)          # dropout p=0.5 -> scale kept by 2
    h = jnp.maximum(jnp.dot(h, w2_ref[...], preferred_element_type=F32) + b2_ref[...], 0.0)
    h = h * (m2_ref[...].astype(F32) * 2.0)
    o_ref[...] = h


def run_prenet(x_flat, m1, m2, w1_t, b1, w2_t, b2, *, tile=128):
    n, in_dim = x_flat.shape
    p_dim = w1_t.shape[1]
    n_pad = ((n + tile - 1) // tile) * tile
    if n_pad != n:
        x_flat = jnp.pad(x_flat, ((0, n_pad - n), (0, 0)))
        m1 = jnp.pad(m1, ((0, n_pad - n), (0, 0)))
        m2 = jnp.pad(m2, ((0, n_pad - n), (0, 0)))
    out = pl.pallas_call(
        prenet_kernel,
        out_shape=jax.ShapeDtypeStruct((n_pad, p_dim), F32),
        grid_spec=pltpu.PrefetchScalarGridSpec(
            num_scalar_prefetch=0,
            grid=(n_pad // tile,),
            in_specs=[
                pl.BlockSpec((tile, in_dim), lambda i: (i, 0)),
                pl.BlockSpec((tile, p_dim), lambda i: (i, 0)),
                pl.BlockSpec((tile, p_dim), lambda i: (i, 0)),
                pl.BlockSpec((in_dim, p_dim), lambda i: (0, 0)),
                pl.BlockSpec((1, p_dim), lambda i: (0, 0)),
                pl.BlockSpec((p_dim, p_dim), lambda i: (0, 0)),
                pl.BlockSpec((1, p_dim), lambda i: (0, 0)),
            ],
            out_specs=pl.BlockSpec((tile, p_dim), lambda i: (i, 0)),
        ),
        compiler_params=pltpu.CompilerParams(dimension_semantics=("parallel",)),
    )(x_flat, m1, m2, w1_t, b1, w2_t, b2)
    return out[:n]


# ----------------------------------------------------------------------------- #
# Decoder step kernel (one grid step per output frame, sequential, time-chunked IO).
# ----------------------------------------------------------------------------- #
def decoder_step_kernel(
    # per-step (time-chunked) inputs
    prenet_ref, d0_ref, d1_ref,
    # constants
    mem_ref, key_ref, mbias_ref,
    wih0p_ref, wih0c_ref, whh0_ref, b0_ref,
    wih1h_ref, wih1c_ref, whh1_ref, b1_ref,
    wq_ref, bq_ref,
    wcomb_ref, bcomb_ref, vw_ref, vb_ref,
    woutq_ref, woutc_ref, bout_ref,
    # outputs (time-chunked)
    melgate_ref, align_ref,
    # scratch (recurrent state)
    h0, c0, h1, c1, aw_cum, ctx,
    *, t_chunk, inv_keep,
):
    t = pl.program_id(0)
    r = t % t_chunk                                   # row inside the current time chunk

    @pl.when(t == 0)
    def _init():
        h0[...] = jnp.zeros_like(h0)
        c0[...] = jnp.zeros_like(c0)
        h1[...] = jnp.zeros_like(h1)
        c1[...] = jnp.zeros_like(c1)
        aw_cum[...] = jnp.zeros_like(aw_cum)          # already conv-padded buffer
        ctx[...] = jnp.zeros_like(ctx)

    def gates_to_state(gates, c):
        rd = c.shape[-1]
        i = jax.nn.sigmoid(gates[:, 0 * rd:1 * rd])
        f = jax.nn.sigmoid(gates[:, 1 * rd:2 * rd])
        g = jnp.tanh(gates[:, 2 * rd:3 * rd])
        o = jax.nn.sigmoid(gates[:, 3 * rd:4 * rd])
        c_new = f * c + i * g
        h_new = o * jnp.tanh(c_new)
        return h_new, c_new

    prenet_out = prenet_ref[r].astype(BF16)           # (B, P)
    ctx_f32 = ctx[...]                                # (B, E) f32
    ctx_b = ctx_f32.astype(BF16)

    # ---- LSTM 0 (split GEMMs: no lane-axis concat) ----
    gates0 = (jnp.dot(prenet_out, wih0p_ref[...], preferred_element_type=F32)
              + jnp.dot(ctx_b, wih0c_ref[...], preferred_element_type=F32)
              + jnp.dot(h0[...].astype(BF16), whh0_ref[...], preferred_element_type=F32)
              + b0_ref[...])
    h0_new, c0_new = gates_to_state(gates0, c0[...])
    h0[...] = h0_new
    c0[...] = c0_new
    x = h0_new * (d0_ref[r].astype(F32) * inv_keep)   # attention dropout (bf16 0/1 mask)

    # ---- LSTM 1 ----
    gates1 = (jnp.dot(x.astype(BF16), wih1h_ref[...], preferred_element_type=F32)
              + jnp.dot(ctx_b, wih1c_ref[...], preferred_element_type=F32)
              + jnp.dot(h1[...].astype(BF16), whh1_ref[...], preferred_element_type=F32)
              + b1_ref[...])
    h1_new, c1_new = gates_to_state(gates1, c1[...])
    h1[...] = h1_new
    c1[...] = c1_new
    query = h1_new * (d1_ref[r].astype(F32) * inv_keep)   # (B, R)

    # ---- location-sensitive attention ----
    b_sz, t_in = mbias_ref.shape
    kc, a_dim = wcomb_ref.shape
    pad = (kc - 1) // 2

    pq = jnp.dot(query.astype(BF16), wq_ref[...], preferred_element_type=F32) + bq_ref[...]

    padded = aw_cum[...]                              # (B, T_in + K - 1), zeros at the borders
    aw = padded[:, pad:pad + t_in]                    # current cumulative weights (B, T_in)

    # fused location conv + location_dense (exact: no nonlinearity between them)
    wc = wcomb_ref[...]                               # (K, A) f32
    loc = jnp.zeros((b_sz, t_in, a_dim), F32)
    for k in range(kc):                               # K static shifted FMAs, no stack/relayout
        loc = loc + padded[:, k:k + t_in, None] * wc[k].reshape(1, 1, -1)

    e = jnp.tanh(pq[:, None, :] + bcomb_ref[...].reshape(1, 1, -1) + loc + key_ref[...])
    energies = (jnp.sum(e * vw_ref[...].reshape(1, 1, -1), axis=-1)
                + vb_ref[...]                         # (1,1) broadcast
                + mbias_ref[...])                     # additive -1e9 padding bias (NaN-safe)

    m = jnp.max(energies, axis=-1, keepdims=True)
    p = jnp.exp(energies - m)
    attn_w = p * (1.0 / jnp.sum(p, axis=-1, keepdims=True))   # (B, T_in)

    ctx_new = jnp.sum(attn_w[:, :, None] * mem_ref[...], axis=1)   # (B, E) f32
    ctx[...] = ctx_new
    aw_cum[:, pad:pad + t_in] = aw + attn_w

    # ---- fused projection + gate (single GEMM, mel|gate packed on the lane axis) ----
    out = (jnp.dot(query.astype(BF16), woutq_ref[...], preferred_element_type=F32)
           + jnp.dot(ctx_new.astype(BF16), woutc_ref[...], preferred_element_type=F32)
           + bout_ref[...])

    melgate_ref[r] = out.astype(melgate_ref.dtype)
    align_ref[r] = attn_w.astype(align_ref.dtype)


def run_decoder_loop(prenet_seq, d0, d1, memory_bf16, key, mbias, kp,
                     *, t_out, t_chunk, inv_keep):
    t_pad, b, p_dim = prenet_seq.shape
    _, t_in, e_dim = memory_bf16.shape
    r_dim = kp['whh0_t'].shape[0]
    mg_dim = kp['bout'].shape[1]
    kc = kp['w_comb'].shape[0]

    const_inputs = [
        memory_bf16, key, mbias,
        kp['wih0p_t'], kp['wih0c_t'], kp['whh0_t'], kp['b0'],
        kp['wih1h_t'], kp['wih1c_t'], kp['whh1_t'], kp['b1'],
        kp['wq_t'], kp['bq'],
        kp['w_comb'], kp['b_comb'], kp['v_w'], kp['v_b'],
        kp['wout_q_t'], kp['wout_c_t'], kp['bout'],
    ]

    def chunk_spec(dim):
        return pl.BlockSpec((t_chunk, b, dim), lambda t, c=t_chunk: (t // c, 0, 0))

    def full_spec(shape):
        nd = len(shape)
        return pl.BlockSpec(shape, lambda t, _nd=nd: (0,) * _nd)

    in_specs = ([chunk_spec(p_dim), chunk_spec(r_dim), chunk_spec(r_dim)]
                + [full_spec(a.shape) for a in const_inputs])
    out_specs = [chunk_spec(mg_dim), chunk_spec(t_in)]
    out_shape = (
        jax.ShapeDtypeStruct((t_pad, b, mg_dim), F32),
        jax.ShapeDtypeStruct((t_pad, b, t_in), F32),
    )
    scratch = [
        pltpu.VMEM((b, r_dim), F32),              # h0
        pltpu.VMEM((b, r_dim), F32),              # c0
        pltpu.VMEM((b, r_dim), F32),              # h1
        pltpu.VMEM((b, r_dim), F32),              # c1
        pltpu.VMEM((b, t_in + kc - 1), F32),      # conv-padded cumulative attention weights
        pltpu.VMEM((b, e_dim), F32),              # attention context
    ]

    kernel = functools.partial(decoder_step_kernel, t_chunk=t_chunk, inv_keep=inv_keep)
    fn = pl.pallas_call(
        kernel,
        out_shape=out_shape,
        grid_spec=pltpu.PrefetchScalarGridSpec(
            num_scalar_prefetch=0,
            grid=(t_out,),
            in_specs=in_specs,
            out_specs=out_specs,
            scratch_shapes=scratch,
        ),
        compiler_params=pltpu.CompilerParams(
            dimension_semantics=("arbitrary",),
            vmem_limit_bytes=64 * 1024 * 1024,
        ),
    )
    return fn(prenet_seq, d0, d1, *const_inputs)


# ----------------------------------------------------------------------------- #
# Full Decoder.forward  (glue in plain JAX: reshapes, mask/key building, parse_outputs)
# ----------------------------------------------------------------------------- #
def decoder_forward(kp, memory, memory_lengths, targets, dropout_rng,
                    n_mels, n_frames_per_step, p_attention_dropout,
                    t_chunk=8, prenet_tile=128):
    b, t_in, _ = memory.shape
    t_out = targets.shape[2]
    r_dim = kp['whh0_t'].shape[0]
    p_dim = kp['prenet_w1_t'].shape[1]
    mg_split = n_mels * n_frames_per_step

    # decoder_inputs = cat(go_frame, targets.permute(2,0,1))[:T_out]  (last target frame unused)
    go = jnp.zeros((1, b, n_mels), F32)
    tgt = jnp.transpose(targets, (2, 0, 1))
    dec_inputs = jnp.concatenate([go, tgt[:t_out - 1]], axis=0)          # (T_out, B, n_mels)

    # prenet (dropout p=0.5, training=True) over the T_out needed frames, gridded
    n_flat = t_out * b
    k1, k2, k3, k4 = jax.random.split(dropout_rng, 4)
    m1 = jax.random.bernoulli(k1, 0.5, (n_flat, p_dim)).astype(BF16)
    m2 = jax.random.bernoulli(k2, 0.5, (n_flat, p_dim)).astype(BF16)
    prenet_flat = run_prenet(dec_inputs.reshape(n_flat, n_mels), m1, m2,
                             kp['prenet_w1_t'], kp['prenet_b1'],
                             kp['prenet_w2_t'], kp['prenet_b2'], tile=prenet_tile)
    prenet_seq = prenet_flat.reshape(t_out, b, p_dim)

    # pad the time axis to a multiple of the chunk size
    t_pad = ((t_out + t_chunk - 1) // t_chunk) * t_chunk
    if t_pad != t_out:
        prenet_seq = jnp.pad(prenet_seq, ((0, t_pad - t_out), (0, 0), (0, 0)))

    # attention-dropout keep-masks (bf16 0/1), scale 1/keep applied in-kernel
    keep = 1.0 - p_attention_dropout
    inv_keep = 0.0 if keep == 0.0 else 1.0 / keep
    d0 = jax.random.bernoulli(k3, keep, (t_pad, b, r_dim)).astype(BF16)
    d1 = jax.random.bernoulli(k4, keep, (t_pad, b, r_dim)).astype(BF16)

    # additive attention-mask bias (torch only masks when B > 1)
    if b > 1:
        ids = jnp.arange(t_in, dtype=jnp.int32)
        mbias = jnp.where(ids[None, :] >= memory_lengths[:, None], -1e9, 0.0).astype(F32)
    else:
        mbias = jnp.zeros((b, t_in), F32)

    # processed memory ("key") precomputed once outside the sequential kernel
    key = (jnp.einsum('bte,ea->bta', memory, kp['wm_t']) + kp['bm'].reshape(1, 1, -1)).astype(F32)

    melgate_seq, align_seq = run_decoder_loop(
        prenet_seq, d0, d1, memory.astype(BF16), key, mbias, kp,
        t_out=t_out, t_chunk=t_chunk, inv_keep=inv_keep)

    melgate_seq = melgate_seq[:t_out]
    align_seq = align_seq[:t_out]
    mel_seq = melgate_seq[..., :mg_split]                                # (T, B, n_mels*nf)
    gate_seq = melgate_seq[..., mg_split:]                               # (T, B, nf)

    # parse_decoder_outputs
    mel_outputs = jnp.transpose(mel_seq, (1, 0, 2)).reshape(b, t_out * n_frames_per_step, n_mels)
    mel_outputs = jnp.transpose(mel_outputs, (0, 2, 1))                  # (B, n_mels, T*nf)
    gate_outputs = jnp.transpose(gate_seq, (1, 0, 2)).reshape(b, -1)     # (B, T*nf)
    alignments = jnp.transpose(align_seq, (1, 2, 0))                     # (B, T_in, T)
    return mel_outputs, gate_outputs, alignments


# ----------------------------------------------------------------------------- #
# Parameters:  torch-convention shapes, then kernel-side fusion / split / transpose / bf16.
# ----------------------------------------------------------------------------- #
def make_torch_params(rng, n_mels, n_frames, e_dim, a_dim, f_loc, k_conv, p_dim, r_dim):
    keys = iter(jax.random.split(rng, 32))

    def nrm(shape, scale=0.1):
        return scale * jax.random.normal(next(keys), shape, dtype=F32)

    return dict(
        prenet_w1=nrm((p_dim, n_mels)), prenet_b1=nrm((p_dim,)),
        prenet_w2=nrm((p_dim, p_dim)), prenet_b2=nrm((p_dim,)),
        lstm0_wih=nrm((4 * r_dim, p_dim + e_dim)), lstm0_whh=nrm((4 * r_dim, r_dim)),
        lstm0_bih=nrm((4 * r_dim,)), lstm0_bhh=nrm((4 * r_dim,)),
        lstm1_wih=nrm((4 * r_dim, r_dim + e_dim)), lstm1_whh=nrm((4 * r_dim, r_dim)),
        lstm1_bih=nrm((4 * r_dim,)), lstm1_bhh=nrm((4 * r_dim,)),
        attn_wq=nrm((a_dim, r_dim)), attn_bq=nrm((a_dim,)),
        attn_wm=nrm((a_dim, e_dim)), attn_bm=nrm((a_dim,)),
        attn_v_w=nrm((1, a_dim)), attn_v_b=nrm((1,)),
        loc_conv_w=nrm((f_loc, 1, k_conv)), loc_conv_b=nrm((f_loc,)),
        loc_dense_w=nrm((a_dim, f_loc)),
        proj_w=nrm((n_mels * n_frames, r_dim + e_dim)), proj_b=nrm((n_mels * n_frames,)),
        gate_w=nrm((n_frames, r_dim + e_dim)), gate_b=nrm((n_frames,)),
    )


def prepare_kernel_params(tp):
    P = tp['prenet_w1'].shape[0]
    R = tp['lstm0_whh'].shape[1]

    def t_(w):
        return jnp.transpose(w)

    # fused projection|gate weight (output dims packed on the lane axis)
    wout = jnp.concatenate([tp['proj_w'], tp['gate_w']], axis=0)      # (M*nf + nf, R+E)
    bout = jnp.concatenate([tp['proj_b'], tp['gate_b']], axis=0)[None, :]

    # fused location conv + dense:  W_comb[k,a] = sum_f conv_w[f,0,k] * Wd[a,f]
    w_comb = jnp.dot(t_(tp['loc_conv_w'][:, 0, :]), t_(tp['loc_dense_w']))   # (K, A)
    b_comb = jnp.dot(tp['loc_dense_w'], tp['loc_conv_b'])[None, :]           # (1, A)

    return dict(
        prenet_w1_t=t_(tp['prenet_w1']), prenet_b1=tp['prenet_b1'][None, :],
        prenet_w2_t=t_(tp['prenet_w2']), prenet_b2=tp['prenet_b2'][None, :],
        # LSTM 0 (input weight pre-split prenet/context so no in-kernel concat)
        wih0p_t=t_(tp['lstm0_wih'][:, :P]).astype(BF16),
        wih0c_t=t_(tp['lstm0_wih'][:, P:]).astype(BF16),
        whh0_t=t_(tp['lstm0_whh']).astype(BF16),
        b0=(tp['lstm0_bih'] + tp['lstm0_bhh'])[None, :],
        # LSTM 1
        wih1h_t=t_(tp['lstm1_wih'][:, :R]).astype(BF16),
        wih1c_t=t_(tp['lstm1_wih'][:, R:]).astype(BF16),
        whh1_t=t_(tp['lstm1_whh']).astype(BF16),
        b1=(tp['lstm1_bih'] + tp['lstm1_bhh'])[None, :],
        # attention
        wq_t=t_(tp['attn_wq']).astype(BF16), bq=tp['attn_bq'][None, :],
        wm_t=t_(tp['attn_wm']), bm=tp['attn_bm'][None, :],
        w_comb=w_comb, b_comb=b_comb,
        v_w=tp['attn_v_w'], v_b=tp['attn_v_b'][None, :],
        # fused projection/gate, pre-split query/context
        wout_q_t=t_(wout[:, :R]).astype(BF16),
        wout_c_t=t_(wout[:, R:]).astype(BF16),
        bout=bout,
    )


if __name__ == "__main__":
    # Small, module-consistent shapes.
    B, T_in, T_out = 2, 8, 6
    n_mels, n_frames_per_step = 8, 1
    encoder_embedding_dim = 16
    attention_dim = 16
    attention_location_n_filters = 4
    attention_location_kernel_size = 5
    prenet_dim = 16
    decoder_rnn_dim = 16
    p_attention_dropout = 0.1

    root = jax.random.PRNGKey(0)
    k_param, k_mem, k_tgt, k_drop = jax.random.split(root, 4)

    torch_params = make_torch_params(k_param, n_mels, n_frames_per_step, encoder_embedding_dim,
                                     attention_dim, attention_location_n_filters,
                                     attention_location_kernel_size, prenet_dim, decoder_rnn_dim)
    kernel_params = prepare_kernel_params(torch_params)

    memory = jax.random.normal(k_mem, (B, T_in, encoder_embedding_dim), dtype=F32)
    memory_lengths = jnp.array([T_in, T_in - 2], dtype=jnp.int32)
    targets = jax.random.normal(k_tgt, (B, n_mels, T_out), dtype=F32)

    mel_out, gate_out, align_out = decoder_forward(
        kernel_params, memory, memory_lengths, targets, k_drop,
        n_mels, n_frames_per_step, p_attention_dropout,
        t_chunk=8, prenet_tile=64)

    jax.block_until_ready((mel_out, gate_out, align_out))
    assert mel_out.shape == (B, n_mels, T_out * n_frames_per_step)
    assert gate_out.shape == (B, T_out * n_frames_per_step)
    assert align_out.shape == (B, T_in, T_out)
    print("KERNEL_OK")
</pallas_src>

<mosaic_0001>
module attributes {stable_mosaic.version = 11 : i64} {
  func.func @prenet_kernel(%arg0: i32, %arg1: memref<64x8xf32, #tpu.memory_space<vmem>>, %arg2: memref<64x16xbf16, #tpu.memory_space<vmem>>, %arg3: memref<64x16xbf16, #tpu.memory_space<vmem>>, %arg4: memref<8x16xf32, #tpu.memory_space<vmem>>, %arg5: memref<1x16xf32, #tpu.memory_space<vmem>>, %arg6: memref<16x16xf32, #tpu.memory_space<vmem>>, %arg7: memref<1x16xf32, #tpu.memory_space<vmem>>, %arg8: memref<64x16xf32, #tpu.memory_space<vmem>>) attributes {dimension_semantics = [#tpu.dimension_semantics<parallel>], iteration_bounds = array<i64: 1>, scalar_prefetch = 0 : i64, scratch_operands = 0 : i64, tpu.core_type = #tpu.core_type<tc>, window_params = [{transform_indices = @transform_0, window_bounds = array<i64: 64, 8>}, {transform_indices = @transform_1, window_bounds = array<i64: 64, 16>}, {transform_indices = @transform_2, window_bounds = array<i64: 64, 16>}, {pipeline_mode = #tpu.pipeline_mode<synchronous>, transform_indices = @transform_3, window_bounds = array<i64: 8, 16>}, {pipeline_mode = #tpu.pipeline_mode<synchronous>, transform_indices = @transform_4, window_bounds = array<i64: 1, 16>}, {pipeline_mode = #tpu.pipeline_mode<synchronous>, transform_indices = @transform_5, window_bounds = array<i64: 16, 16>}, {pipeline_mode = #tpu.pipeline_mode<synchronous>, transform_indices = @transform_6, window_bounds = array<i64: 1, 16>}, {transform_indices = @transform_7, window_bounds = array<i64: 64, 16>}]} {
    %c0 = arith.constant 0 : index
    %c0_0 = arith.constant 0 : index
    %0 = vector.load %arg1[%c0, %c0_0] : memref<64x8xf32, #tpu.memory_space<vmem>>, vector<64x8xf32>
    %c0_1 = arith.constant 0 : index
    %c0_2 = arith.constant 0 : index
    %1 = vector.load %arg4[%c0_1, %c0_2] : memref<8x16xf32, #tpu.memory_space<vmem>>, vector<8x16xf32>
    %cst = arith.constant dense<0.000000e+00> : vector<64x16xf32>
    %2 = tpu.matmul %0, %1, %cst {dimension_numbers = #tpu.dot_dimension_numbers<[1], [0], [0], [1], [0, 0, 1, 1], [], []>} : vector<64x8xf32>, vector<8x16xf32>, vector<64x16xf32> -> vector<64x16xf32>
    %c0_3 = arith.constant 0 : index
    %c0_4 = arith.constant 0 : index
    %3 = vector.load %arg5[%c0_3, %c0_4] : memref<1x16xf32, #tpu.memory_space<vmem>>, vector<1x16xf32>
    %4 = vector.broadcast %3 : vector<1x16xf32> to vector<64x16xf32>
    %5 = arith.addf %2, %4 : vector<64x16xf32>
    %cst_5 = arith.constant 0.000000e+00 : f32
    %6 = vector.broadcast %cst_5 : f32 to vector<64x16xf32>
    %7 = arith.maximumf %5, %6 : vector<64x16xf32>
    %c0_6 = arith.constant 0 : index
    %c0_7 = arith.constant 0 : index
    %8 = vector.load %arg2[%c0_6, %c0_7] : memref<64x16xbf16, #tpu.memory_space<vmem>>, vector<64x16xbf16>
    %9 = arith.extf %8 : vector<64x16xbf16> to vector<64x16xf32>
    %cst_8 = arith.constant 2.000000e+00 : f32
    %10 = vector.broadcast %cst_8 : f32 to vector<64x16xf32>
    %11 = arith.mulf %9, %10 : vector<64x16xf32>
    %12 = arith.mulf %7, %11 : vector<64x16xf32>
    %c0_9 = arith.constant 0 : index
    %c0_10 = arith.constant 0 : index
    %13 = vector.load %arg6[%c0_9, %c0_10] : memref<16x16xf32, #tpu.memory_space<vmem>>, vector<16x16xf32>
    %cst_11 = arith.constant dense<0.000000e+00> : vector<64x16xf32>
    %14 = tpu.matmul %12, %13, %cst_11 {dimension_numbers = #tpu.dot_dimension_numbers<[1], [0], [0], [1], [0, 0, 1, 1], [], []>} : vector<64x16xf32>, vector<16x16xf32>, vector<64x16xf32> -> vector<64x16xf32>
    %c0_12 = arith.constant 0 : index
    %c0_13 = arith.constant 0 : index
    %15 = vector.load %arg7[%c0_12, %c0_13] : memref<1x16xf32, #tpu.memory_space<vmem>>, vector<1x16xf32>
    %16 = vector.broadcast %15 : vector<1x16xf32> to vector<64x16xf32>
    %17 = arith.addf %14, %16 : vector<64x16xf32>
    %cst_14 = arith.constant 0.000000e+00 : f32
    %18 = vector.broadcast %cst_14 : f32 to vector<64x16xf32>
    %19 = arith.maximumf %17, %18 : vector<64x16xf32>
    %c0_15 = arith.constant 0 : index
    %c0_16 = arith.constant 0 : index
    %20 = vector.load %arg3[%c0_15, %c0_16] : memref<64x16xbf16, #tpu.memory_space<vmem>>, vector<64x16xbf16>
    %21 = arith.extf %20 : vector<64x16xbf16> to vector<64x16xf32>
    %cst_17 = arith.constant 2.000000e+00 : f32
    %22 = vector.broadcast %cst_17 : f32 to vector<64x16xf32>
    %23 = arith.mulf %21, %22 : vector<64x16xf32>
    %24 = arith.mulf %19, %23 : vector<64x16xf32>
    %c0_18 = arith.constant 0 : index
    %c0_19 = arith.constant 0 : index
    %25 = vector.load %arg8[%c0_18, %c0_19] : memref<64x16xf32, #tpu.memory_space<vmem>>, vector<64x16xf32>
    tpu.vector_store %arg8[%c0_18, %c0_19], %24 {strides = array<i32>} : memref<64x16xf32, #tpu.memory_space<vmem>>, vector<64x16xf32>,
    return
  }
  func.func @transform_0(%arg0: i32) -> (i32, i32) {
    %c0_i32 = arith.constant 0 : i32
    %c0_i32_0 = arith.constant 0 : i32
    return %arg0, %c0_i32 : i32, i32
  }
  func.func @transform_1(%arg0: i32) -> (i32, i32) {
    %c0_i32 = arith.constant 0 : i32
    %c0_i32_0 = arith.constant 0 : i32
    return %arg0, %c0_i32 : i32, i32
  }
  func.func @transform_2(%arg0: i32) -> (i32, i32) {
    %c0_i32 = arith.constant 0 : i32
    %c0_i32_0 = arith.constant 0 : i32
    return %arg0, %c0_i32 : i32, i32
  }
  func.func @transform_3(%arg0: i32) -> (i32, i32) {
    %c0_i32 = arith.constant 0 : i32
    %c0_i32_0 = arith.constant 0 : i32
    %c0_i32_1 = arith.constant 0 : i32
    return %c0_i32, %c0_i32_0 : i32, i32
  }
  func.func @transform_4(%arg0: i32) -> (i32, i32) {
    %c0_i32 = arith.constant 0 : i32
    %c0_i32_0 = arith.constant 0 : i32
    %c0_i32_1 = arith.constant 0 : i32
    return %c0_i32, %c0_i32_0 : i32, i32
  }
  func.func @transform_5(%arg0: i32) -> (i32, i32) {
    %c0_i32 = arith.constant 0 : i32
    %c0_i32_0 = arith.constant 0 : i32
    %c0_i32_1 = arith.constant 0 : i32
    return %c0_i32, %c0_i32_0 : i32, i32
  }
  func.func @transform_6(%arg0: i32) -> (i32, i32) {
    %c0_i32 = arith.constant 0 : i32
    %c0_i32_0 = arith.constant 0 : i32
    %c0_i32_1 = arith.constant 0 : i32
    return %c0_i32, %c0_i32_0 : i32, i32
  }
  func.func @transform_7(%arg0: i32) -> (i32, i32) {
    %c0_i32 = arith.constant 0 : i32
    %c0_i32_0 = arith.constant 0 : i32
    return %arg0, %c0_i32 : i32, i32
  }
}

</mosaic_0001>

<bundles_post_ra>
// kernel: tpu_custom_call.1
= control target key start
LH: loop header
LB: loop body
LE: loop exit
PB: predicated region body
PF: predicated region fallthrough
CT: control target
= control target key end

     0   :  { %vm42_vm0 = vcmask 64512   ;;  %vm221_vm1 = vcmask 130048   ;;  %s659_s3 = inlined_call_operand.vmem [shape: f32[8,16], index: 3, kind: input, shape index: {}]   ;;  %s660_s0 = inlined_call_operand.vmem [shape: f32[64,8], index: 0, kind: input, shape index: {}]   ;;  %s661_s5 = inlined_call_operand.vmem [shape: f32[16,16], index: 5, kind: input, shape index: {}]   ;;  %s662_s1 = inlined_call_operand.vmem [shape: bf16[64,16], index: 1, kind: input, shape index: {}]   ;;  %s663_s4 = inlined_call_operand.vmem [shape: f32[1,16], index: 4, kind: input, shape index: {}]   ;;  %s664_s2 = inlined_call_operand.vmem [shape: bf16[64,16], index: 2, kind: input, shape index: {}]   ;;  %s665_s6 = inlined_call_operand.vmem [shape: f32[1,16], index: 6, kind: input, shape index: {}]   ;;  %s666_s7 = inlined_call_operand.vmem [shape: f32[64,16], index: 7, kind: output, shape index: {}]  }
   0x1   :  { %v34_v0 = vld [vmem:[%s659_s3] sm:$0xff]  ;;  %v27_v2 = vld [vmem:[%s660_s0 + $0x8] sm:$0xff]  ;;  %v28_v3 = vld [vmem:[%s660_s0 + $0x10] sm:$0xff] }
   0x2   :  { %v26_v1 = vld [vmem:[%s660_s0] sm:$0xff]  ;;  %478 = vmatprep.subr.mxu0 %v34_v0  ;;  %v29_v4 = vld [vmem:[%s660_s0 + $0x18] sm:$0xff]  ;;  %v31_v6 = vld [vmem:[%s660_s0 + $0x28] sm:$0xff] }
   0x3   :  { %480 = vmatprep.mubr.msk.f32.mxu0 %vm42_vm0, %v26_v1  ;;  %479 = vmatpush3.msra.mxu0 %v34_v0  ;;  %v30_v5 = vld [vmem:[%s660_s0 + $0x20] sm:$0xff]  ;;  %v32_v7 = vld [vmem:[%s660_s0 + $0x30] sm:$0xff]  ;;  %v33_v8 = vld [vmem:[%s660_s0 + $0x38] sm:$0xff] }
   0x4   :  { %481 = vmatmul.mubr.msk.f32.vlgmr.msra.gmra.mxu0 %vm42_vm0, %v27_v2  ;;  %v213_v9 = vld [vmem:[%s661_s5 + $0x8] sm:$0xff]  ;;  %v212_v10 = vld [vmem:[%s661_s5] sm:$0xff]  ;;  %v454_v28 = vld [vmem:[%s662_s1 + $0x10] sm:$0xff]  }
   0x5   :  { %483 = vmatprep.mubr.msk.f32.mxu0 %vm42_vm0, %v28_v3  ;;  %492 = vmatprep.subr.mxu1 %v213_v9  ;;  %v422_v11 = vld [vmem:[%s662_s1] sm:$0xff]   ;;  %v453_v17 = vld [vmem:[%s662_s1 + $0x8] sm:$0xff]   ;;  %v431_v33 = vunpack.c.l.bf16 %v454_v28  ;;  %v432_v38 = vunpack.c.h.bf16 %v454_v28  ;;  %v455_v41 = vld [vmem:[%s662_s1 + $0x18] sm:$0xff]  }
   0x6   :  { %493 = vmatpush3.msra.mxu1 %v213_v9  ;;  %v403_v12 = vld [vmem:[%s663_s4] ss:$0 sm:$0xff]  ;;  %v423_v13 = vunpack.c.l.bf16 %v422_v11  ;;  %v424_v15 = vunpack.c.h.bf16 %v422_v11  ;;  %v427_v20 = vunpack.c.l.bf16 %v453_v17  ;;  %v428_v25 = vunpack.c.h.bf16 %v453_v17  ;;  %v456_v3 = vld [vmem:[%s664_s2 + $0x8] sm:$0xff]   ;;  %v457_v9 = vld [vmem:[%s664_s2 + $0x10] sm:$0xff]  }
   0x7   :  { %494 = vmatprep.subr.mxu1 %v212_v10  ;;  %v200_v45 = vmul.f32 2.0, %v431_v33  ;;  %v435_v46 = vunpack.c.l.bf16 %v455_v41  ;;  %v201_v49 = vmul.f32 2.0, %v432_v38  ;;  %v436_v51 = vunpack.c.h.bf16 %v455_v41  ;;  %v438_v0 = vld [vmem:[%s664_s2] sm:$0xff]  }
   0x8   :  { %484 = vmatmul.mubr.msk.f32.gmra.mxu0 %vm42_vm0, %v29_v4  ;;  %495 = vmatpush3.msra.mxu1 %v212_v10  ;;  %v196_v21 = vmul.f32 2.0, %v423_v13  ;;  %v197_v23 = vmul.f32 2.0, %v424_v15  ;;  %v198_v31 = vmul.f32 2.0, %v427_v20  ;;  %v199_v36 = vmul.f32 2.0, %v428_v25  ;;  %v412_v2 = vld [vmem:[%s665_s6] ss:$0 sm:$0xff] }
   0x9   :  { %486 = vmatprep.mubr.msk.f32.mxu0 %vm42_vm0, %v30_v5  ;;  %v202_v57 = vmul.f32 2.0, %v435_v46  ;;  %v203_v60 = vmul.f32 2.0, %v436_v51  ;;  %v440_v1 = vunpack.c.h.bf16 %v438_v0  ;;  %v439_v4 = vunpack.c.l.bf16 %v438_v0 }
   0xb   :  { %v375_v13 = vmul.f32 2.0, %v439_v4 }
   0xc   :  { %487 = vmatmul.mubr.msk.f32.gmra.mxu0 %vm42_vm0, %v31_v6 }
   0xd   :  { %489 = vmatprep.mubr.msk.f32.mxu0 %vm42_vm0, %v32_v7  ;;  %v376_v7 = vmul.f32 2.0, %v440_v1 }
  0x10   :  { %490 = vmatmul.mubr.msk.f32.gmra.mxu0 %vm42_vm0, %v33_v8  ;;  %v444_v8 = vunpack.c.h.bf16 %v456_v3 }
  0x12   :  { %v378_v20 = vmul.f32 2.0, %v444_v8 }
  0xc4   :  { %v482_v14 = vpop.f32.mrf.mxu0 }
  0xc5   :  { %v139_v16 = vadd.f32 %v482_v14, %v403_v12  ;;  %v443_v14 = vunpack.c.l.bf16 %v456_v3 }
  0xc6   :  { %v133_v18 = vpop.f32.mrf.mxu0 }
  0xc7   :  { %v134_v19 = vadd.f32 %v403_v12, %v133_v18  ;;  %v173_v22 = vmax.f32 %v139_v16, 0.0  ;;  %v448_v16 = vunpack.c.h.bf16 %v457_v9 }
  0xc8   :  { %v485_v24 = vpop.f32.mrf.mxu0 }
  0xc9   :  { %v172_v26 = vmax.f32 %v134_v19, 0.0  ;;  %v149_v27 = vadd.f32 %v485_v24, %v403_v12  ;;  %v205_v34 = vmul.f32 %v197_v23, %v173_v22  ;;  %v447_v22 = vunpack.c.l.bf16 %v457_v9  ;;  %v458_v23 = vld [vmem:[%s664_s2 + $0x18] sm:$0xff]  }
  0xca   :  { %v143_v29 = vpop.f32.mrf.mxu0  ;;  %v452_v33 = vunpack.c.h.bf16 %v458_v23 }
  0xcb   :  { %v144_v30 = vadd.f32 %v403_v12, %v143_v29  ;;  %v204_v32 = vmul.f32 %v196_v21, %v172_v26  ;;  %v175_v35 = vmax.f32 %v149_v27, 0.0  ;;  %v377_v27 = vmul.f32 2.0, %v443_v14 }
  0xcc   :  { %v488_v37 = vpop.f32.mrf.mxu0  ;;  %v380_v29 = vmul.f32 2.0, %v448_v16 }
  0xcd   :  { %v174_v39 = vmax.f32 %v144_v30, 0.0  ;;  %v159_v40 = vadd.f32 %v488_v37, %v403_v12  ;;  %496 = vmatprep.mubr.msk.f32.mxu1 %vm221_vm1, %v204_v32  ;;  %v207_v47 = vmul.f32 %v199_v36, %v175_v35  ;;  %v379_v35 = vmul.f32 2.0, %v447_v22 }
  0xce   :  { %v153_v42 = vpop.f32.mrf.mxu0  ;;  %497 = vmatmul.mubr.msk.f32.vlgmr.msra.gmra.mxu1 %vm221_vm1, %v205_v34 }
  0xcf   :  { %v206_v43 = vmul.f32 %v198_v31, %v174_v39  ;;  %v154_v44 = vadd.f32 %v403_v12, %v153_v42  ;;  %v177_v48 = vmax.f32 %v159_v40, 0.0  ;;  %v451_v39 = vunpack.c.l.bf16 %v458_v23 }
  0xd0   :  { %v491_v50 = vpop.f32.mrf.mxu0 }
  0xd1   :  { %v176_v52 = vmax.f32 %v154_v44, 0.0  ;;  %v169_v53 = vadd.f32 %v491_v50, %v403_v12  ;;  %499 = vmatprep.mubr.msk.f32.mxu1 %vm221_vm1, %v206_v43  ;;  %v209_v58 = vmul.f32 %v201_v49, %v177_v48  ;;  %v382_v44 = vmul.f32 2.0, %v452_v33 }
  0xd2   :  { %v163_v54 = vpop.f32.mrf.mxu0  ;;  %500 = vmatmul.mubr.msk.f32.gmra.mxu1 %vm221_vm1, %v207_v47  ;;  %v381_v49 = vmul.f32 2.0, %v451_v39 }
  0xd3   :  { %v208_v55 = vmul.f32 %v200_v45, %v176_v52  ;;  %v164_v56 = vadd.f32 %v403_v12, %v163_v54  ;;  %v179_v59 = vmax.f32 %v169_v53, 0.0 }
  0xd5   :  { %v178_v61 = vmax.f32 %v164_v56, 0.0  ;;  %502 = vmatprep.mubr.msk.f32.mxu1 %vm221_vm1, %v208_v55  ;;  %v211_v63 = vmul.f32 %v203_v60, %v179_v59 }
  0xd6   :  { %503 = vmatmul.mubr.msk.f32.gmra.mxu1 %vm221_vm1, %v209_v58 }
  0xd7   :  { %v210_v62 = vmul.f32 %v202_v57, %v178_v61 }
  0xd9   :  { %505 = vmatprep.mubr.msk.f32.mxu1 %vm221_vm1, %v210_v62 }
  0xda   :  { %506 = vmatmul.mubr.msk.f32.gmra.mxu1 %vm221_vm1, %v211_v63 }
 0x18e   :  { %v498_v5 = vpop.f32.mrf.mxu1 }
 0x18f   :  { %v318_v6 = vadd.f32 %v498_v5, %v412_v2 }
 0x190   :  { %v312_v10 = vpop.f32.mrf.mxu1 }
 0x191   :  { %v352_v11 = vmax.f32 %v318_v6, 0.0  ;;  %v313_v12 = vadd.f32 %v412_v2, %v312_v10 }
 0x192   :  { %v501_v15 = vpop.f32.mrf.mxu1 }
 0x193   :  { %v384_v17 = vmul.f32 %v376_v7, %v352_v11  ;;  %v351_v18 = vmax.f32 %v313_v12, 0.0  ;;  %v328_v19 = vadd.f32 %v501_v15, %v412_v2 }
 0x194   :  { %v322_v21 = vpop.f32.mrf.mxu1 }
 0x195   :  { %392 = vst.msk [vmem:[%s666_s7 + $0x8] sm:$0xff] %vm221_vm1, %v384_v17  ;;  %v383_v24 = vmul.f32 %v375_v13, %v351_v18  ;;  %v354_v25 = vmax.f32 %v328_v19, 0.0  ;;  %v323_v26 = vadd.f32 %v412_v2, %v322_v21 }
 0x196   :  { %v504_v28 = vpop.f32.mrf.mxu1 }
 0x197   :  { %391 = vst.msk [vmem:[%s666_s7] sm:$0xff] %vm221_vm1, %v383_v24  ;;  %v386_v30 = vmul.f32 %v378_v20, %v354_v25  ;;  %v353_v31 = vmax.f32 %v323_v26, 0.0  ;;  %v338_v32 = vadd.f32 %v504_v28, %v412_v2 }
 0x198   :  { %v332_v34 = vpop.f32.mrf.mxu1 }
 0x199   :  { %394 = vst.msk [vmem:[%s666_s7 + $0x18] sm:$0xff] %vm221_vm1, %v386_v30  ;;  %v385_v36 = vmul.f32 %v377_v27, %v353_v31  ;;  %v356_v37 = vmax.f32 %v338_v32, 0.0  ;;  %v333_v38 = vadd.f32 %v412_v2, %v332_v34 }
 0x19a   :  { %v507_v40 = vpop.f32.mrf.mxu1 }
 0x19b   :  { %393 = vst.msk [vmem:[%s666_s7 + $0x10] sm:$0xff] %vm221_vm1, %v385_v36  ;;  %v388_v41 = vmul.f32 %v380_v29, %v356_v37  ;;  %v355_v42 = vmax.f32 %v333_v38, 0.0  ;;  %v348_v43 = vadd.f32 %v507_v40, %v412_v2 }
 0x19c   :  { %v342_v45 = vpop.f32.mrf.mxu1 }
 0x19d   :  { %396 = vst.msk [vmem:[%s666_s7 + $0x28] sm:$0xff] %vm221_vm1, %v388_v41  ;;  %v387_v46 = vmul.f32 %v379_v35, %v355_v42  ;;  %v358_v47 = vmax.f32 %v348_v43, 0.0  ;;  %v343_v48 = vadd.f32 %v412_v2, %v342_v45 }
 0x19f   :  { %395 = vst.msk [vmem:[%s666_s7 + $0x20] sm:$0xff] %vm221_vm1, %v387_v46  ;;  %v390_v50 = vmul.f32 %v382_v44, %v358_v47  ;;  %v357_v51 = vmax.f32 %v343_v48, 0.0 }
 0x1a1   :  { %398 = vst.msk [vmem:[%s666_s7 + $0x38] sm:$0xff] %vm221_vm1, %v390_v50  ;;  %v389_v52 = vmul.f32 %v381_v49, %v357_v51 }
 0x1a3   :  { %397 = vst.msk [vmem:[%s666_s7 + $0x30] sm:$0xff] %vm221_vm1, %v389_v52 }

</bundles_post_ra>
